<compile_context>
chip_gen: v7x
topology: tpu7x:2x2x1
jax: 0.10.0
libtpu: 0.0.40
codegen_flags: <defaults>
</compile_context>

<pallas_src>
import jax
import jax.numpy as jnp
from jax.experimental import pallas as pl
from jax.experimental.pallas import tpu as pltpu


def _glove_tile_kernel(wi_ref, wj_ref, bsum_ref, out_ref):
    """One grid step handles a whole tile of Tp pairs.

    wi_ref, wj_ref : VMEM [Tp, K]      gathered rows W[ii], W[jj] for this tile
    bsum_ref       : VMEM f32[Rs, 128] B[ii] + B[jj], lane-dense (Rs = Tp//128)
    out_ref        : VMEM f32[Rs, 128] lane-dense output block
    """
    wi = wi_ref[...].astype(jnp.float32)
    wj = wj_ref[...].astype(jnp.float32)
    rs, lanes = out_ref.shape
    k = wi.shape[-1]
    # Leading-dim split only (layout-trivial reshape), then reduce over the
    # lane axis; all Tp dot products are produced in one shot.
    prod = (wi * wj).reshape(rs, lanes, k)
    out_ref[...] = jnp.sum(prod, axis=-1) + bsum_ref[...]


def _round_up(x, m):
    return ((x + m - 1) // m) * m


def glove_forward_pairs(W, B, ii, jj, *, pairs_per_block=2048,
                        vmem_budget_bytes=12 * 1024 * 1024):
    """Batched GloVe forward.

    Returns f32[N] with out[n] = dot(W[ii[n]], W[jj[n]]) + B[ii[n]] + B[jj[n]].
    """
    V, K = W.shape
    ii = jnp.clip(jnp.asarray(ii, dtype=jnp.int32), 0, V - 1)  # bounds-safety
    jj = jnp.clip(jnp.asarray(jj, dtype=jnp.int32), 0, V - 1)
    n = int(ii.shape[0])

    itemsize = jnp.dtype(W.dtype).itemsize

    # Pair-tile size: multiple of 128 (one lane-dense output row per 128
    # pairs), capped by the VMEM budget for the double-buffered (Tp, K)
    # inputs and by the padded problem size (don't over-pad tiny batches).
    # The default budget fits every generation's default scoped VMEM; raise
    # pairs_per_block / vmem_budget_bytes (plus vmem_limit_bytes) on v6e for
    # deeper pipelining if desired.
    bytes_per_pair = 2 * 2 * K * itemsize          # 2 inputs x 2 pipeline bufs
    tp_cap = max(128, (vmem_budget_bytes // bytes_per_pair) // 128 * 128)
    Tp = min(int(pairs_per_block), tp_cap, _round_up(n, 128))
    Tp = max(128, (Tp // 128) * 128)
    Rs = Tp // 128

    n_pad = _round_up(n, Tp)
    nb = n_pad // Tp
    pad = n_pad - n
    ii_p = jnp.pad(ii, (0, pad))                   # padded pairs hit row 0
    jj_p = jnp.pad(jj, (0, pad))

    # Wrapper-side gather: two contiguous (n_pad, K) slabs in W's stored dtype.
    Wi = jnp.take(W, ii_p, axis=0)
    Wj = jnp.take(W, jj_p, axis=0)

    # Bias sum, already in the kernel's lane-dense output layout.
    b = B.astype(jnp.float32)
    bsum = (jnp.take(b, ii_p) + jnp.take(b, jj_p)).reshape(nb, Rs, 128)

    cost = pl.CostEstimate(
        flops=2 * K * n_pad,
        transcendentals=0,
        bytes_accessed=2 * n_pad * K * itemsize    # Wi, Wj
        + n_pad * 4                                # bsum
        + n_pad * 4,                               # out
    )

    out = pl.pallas_call(
        _glove_tile_kernel,
        out_shape=jax.ShapeDtypeStruct((nb, Rs, 128), jnp.float32),
        grid_spec=pltpu.PrefetchScalarGridSpec(
            num_scalar_prefetch=0,
            grid=(nb,),
            in_specs=[
                pl.BlockSpec((Tp, K), lambda blk: (blk, 0)),
                pl.BlockSpec((Tp, K), lambda blk: (blk, 0)),
                pl.BlockSpec((None, Rs, 128), lambda blk: (blk, 0, 0)),
            ],
            out_specs=pl.BlockSpec((None, Rs, 128), lambda blk: (blk, 0, 0)),
        ),
        compiler_params=pltpu.CompilerParams(
            dimension_semantics=("parallel",),
        ),
        cost_estimate=cost,
    )(Wi, Wj, bsum)

    return out.reshape(-1)[:n]


def glove_forward(W, B, i, j):
    """Original module semantics: scalar forward(i, j)."""
    out = glove_forward_pairs(
        W, B,
        jnp.asarray([i], dtype=jnp.int32),
        jnp.asarray([j], dtype=jnp.int32),
    )
    return out[0]


if __name__ == "__main__":
    # Small deterministic parameters (matches torch.randn init shapes).
    V, K = 64, 128
    key = jax.random.PRNGKey(0)
    kW, kB, kI, kJ = jax.random.split(key, 4)
    W = jax.random.normal(kW, (V, K), dtype=jnp.float32)
    B = jax.random.normal(kB, (V,), dtype=jnp.float32)

    # Batched pairs; N not a multiple of 128 so tail padding is exercised.
    N = 300
    ii = jax.random.randint(kI, (N,), 0, V, dtype=jnp.int32)
    jj = jax.random.randint(kJ, (N,), 0, V, dtype=jnp.int32)
    ref = jnp.sum(W[ii] * W[jj], axis=-1) + B[ii] + B[jj]

    # Single-block path (one grid step covers every pair).
    out = jax.block_until_ready(glove_forward_pairs(W, B, ii, jj))
    assert jnp.allclose(out, ref, rtol=1e-5, atol=1e-4), (out, ref)

    # Multi-block path (forces several grid steps / the DMA pipeline).
    out_mb = jax.block_until_ready(
        glove_forward_pairs(W, B, ii, jj, pairs_per_block=128))
    assert jnp.allclose(out_mb, ref, rtol=1e-5, atol=1e-4), (out_mb, ref)

    # Original scalar forward(i, j).
    i, j = 3, 11
    s = jax.block_until_ready(glove_forward(W, B, i, j))
    s_ref = jnp.dot(W[i], W[j]) + B[i] + B[j]
    assert jnp.allclose(s, s_ref, rtol=1e-5, atol=1e-4), (s, s_ref)

    print("KERNEL_OK")
</pallas_src>

<mosaic_0001>
module attributes {stable_mosaic.version = 11 : i64} {
  func.func @_glove_tile_kernel(%arg0: i32, %arg1: memref<384x128xf32, #tpu.memory_space<vmem>>, %arg2: memref<384x128xf32, #tpu.memory_space<vmem>>, %arg3: memref<1x3x128xf32, #tpu.memory_space<vmem>>, %arg4: memref<1x3x128xf32, #tpu.memory_space<vmem>>) attributes {dimension_semantics = [#tpu.dimension_semantics<parallel>], iteration_bounds = array<i64: 1>, scalar_prefetch = 0 : i64, scratch_operands = 0 : i64, tpu.core_type = #tpu.core_type<tc>, window_params = [{transform_indices = @transform_0, window_bounds = array<i64: 384, 128>}, {transform_indices = @transform_1, window_bounds = array<i64: 384, 128>}, {transform_indices = @transform_2, window_bounds = array<i64: 1, 3, 128>}, {transform_indices = @transform_3, window_bounds = array<i64: 1, 3, 128>}]} {
    %c0 = arith.constant 0 : index
    %c0_0 = arith.constant 0 : index
    %0 = vector.load %arg1[%c0, %c0_0] : memref<384x128xf32, #tpu.memory_space<vmem>>, vector<384x128xf32>
    %c0_1 = arith.constant 0 : index
    %c0_2 = arith.constant 0 : index
    %1 = vector.load %arg2[%c0_1, %c0_2] : memref<384x128xf32, #tpu.memory_space<vmem>>, vector<384x128xf32>
    %2 = arith.mulf %0, %1 : vector<384x128xf32>
    %3 = vector.shape_cast %2 : vector<384x128xf32> to vector<3x128x128xf32>
    %cst = arith.constant dense<0.000000e+00> : vector<3x128xf32>
    %4 = vector.multi_reduction <add>, %3, %cst [2] : vector<3x128x128xf32> to vector<3x128xf32>
    %c0_3 = arith.constant 0 : index
    %c0_4 = arith.constant 0 : index
    %c0_5 = arith.constant 0 : index
    %5 = vector.load %arg3[%c0_3, %c0_4, %c0_5] : memref<1x3x128xf32, #tpu.memory_space<vmem>>, vector<1x3x128xf32>
    %6 = vector.shape_cast %5 : vector<1x3x128xf32> to vector<3x128xf32>
    %7 = arith.addf %4, %6 : vector<3x128xf32>
    %c0_6 = arith.constant 0 : index
    %c0_7 = arith.constant 0 : index
    %c0_8 = arith.constant 0 : index
    %8 = vector.load %arg4[%c0_6, %c0_7, %c0_8] : memref<1x3x128xf32, #tpu.memory_space<vmem>>, vector<1x3x128xf32>
    %9 = vector.shape_cast %8 : vector<1x3x128xf32> to vector<3x128xf32>
    %10 = vector.shape_cast %7 : vector<3x128xf32> to vector<1x3x128xf32>
    tpu.vector_store %arg4[%c0_6, %c0_7, %c0_8], %10 {strides = array<i32>} : memref<1x3x128xf32, #tpu.memory_space<vmem>>, vector<1x3x128xf32>,
    return
  }
  func.func @transform_0(%arg0: i32) -> (i32, i32) {
    %c0_i32 = arith.constant 0 : i32
    %c0_i32_0 = arith.constant 0 : i32
    return %arg0, %c0_i32 : i32, i32
  }
  func.func @transform_1(%arg0: i32) -> (i32, i32) {
    %c0_i32 = arith.constant 0 : i32
    %c0_i32_0 = arith.constant 0 : i32
    return %arg0, %c0_i32 : i32, i32
  }
  func.func @transform_2(%arg0: i32) -> (i32, i32, i32) {
    %c0_i32 = arith.constant 0 : i32
    %c0_i32_0 = arith.constant 0 : i32
    %c0_i32_1 = arith.constant 0 : i32
    return %arg0, %c0_i32, %c0_i32_0 : i32, i32, i32
  }
  func.func @transform_3(%arg0: i32) -> (i32, i32, i32) {
    %c0_i32 = arith.constant 0 : i32
    %c0_i32_0 = arith.constant 0 : i32
    %c0_i32_1 = arith.constant 0 : i32
    return %arg0, %c0_i32, %c0_i32_0 : i32, i32, i32
  }
}

</mosaic_0001>

<bundles_post_ra>
// kernel: tpu_custom_call.1
= control target key start
LH: loop header
LB: loop body
LE: loop exit
PB: predicated region body
PF: predicated region fallthrough
CT: control target
= control target key end

     0   :  { %8 = vsyncpa [#allocation3], 0  ;;  %s1476_s0 = inlined_call_operand.hbm [shape: f32[384,128], index: 0, kind: input, shape index: {}]   ;;  %s1477_s1 = inlined_call_operand.hbm [shape: f32[384,128], index: 1, kind: input, shape index: {}]   ;;  %s1478_s2 = inlined_call_operand.vmem [shape: f32[1,3,128], index: 2, kind: input, shape index: {}]   ;;  %s1479_s3 = inlined_call_operand.vmem [shape: f32[1,3,128], index: 3, kind: output, shape index: {}]  }
   0x1   :  { %9 = vsyncpa [#allocation5], 0  ;;  %s1109_s12 = smov [#allocation2]   ;;  %s1061_s16 = scalar_lea.hbm %s1476_s0, 6144 }
   0x2   :  { %s15_s13 = sshll.u32 %s1109_s12, 4  ;;  %p1062_p0 = scmp.ne.s32.totalorder %s1476_s0, %s1061_s16  ;;  %s16_s13 = int_to_ptr.vmem [resolvable:$true] %s15_s13 }
   0x3   :  { %p1065_p1 = scmp.lt.u32.totalorder %s1061_s16, %s1476_s0 }
   0x5   :  { %p1067_p2 = pnand %p1065_p1, %p1062_p0 }
   0x7   :  { %1070 = shalt.err (!%p1067_p2)
}
   0x8   :  { %s1071_s21 = scalar_lea.vmem %s16_s13, 6144  ;;  %p1076_p4 = scmp.lt.s32.totalorder %s16_s13, %s16_s13 }
   0x9   :  { %p1072_p3 = scmp.ne.s32.totalorder %s16_s13, %s1071_s21  ;;  %p1077_p5 = scmp.lt.s32.totalorder %s1071_s21, %s1071_s21 }
   0xb   :  { %p1078_p6 = por %p1077_p5, %p1076_p4 }
   0xd   :  { %p1079_p7 = pnand %p1078_p6, %p1072_p3 }
   0xf   :  { %1082 = shalt.err (!%p1079_p7)
}
  0x10   :  { %s1110_s22 = smov 128   ;;  %s1111_s23 = smov 8  }
  0x11   :  { %21 = dma.hbm_to_vmem [thread:$0]  %s1476_s0, 6144, %s16_s13, [#allocation3], %s1110_s22, %s1110_s22, %s1111_s23  }
  0x12   :  { %s1112_s26 = smov [#allocation4]   ;;  %s1083_s30 = scalar_lea.hbm %s1477_s1, 6144 }
  0x13   :  { %s27_s27 = sshll.u32 %s1112_s26, 4  ;;  %p1084_p8 = scmp.ne.s32.totalorder %s1477_s1, %s1083_s30  ;;  %s28_s27 = int_to_ptr.vmem [resolvable:$true] %s27_s27 }
  0x14   :  { %p1087_p9 = scmp.lt.u32.totalorder %s1083_s30, %s1477_s1 }
  0x16   :  { %p1089_p10 = pnand %p1087_p9, %p1084_p8 }
  0x18   :  { %1092 = shalt.err (!%p1089_p10)
}
  0x19   :  { %s1093_s8 = scalar_lea.vmem %s28_s27, 6144  ;;  %p1098_p12 = scmp.lt.s32.totalorder %s28_s27, %s28_s27 }
  0x1a   :  { %p1094_p11 = scmp.ne.s32.totalorder %s28_s27, %s1093_s8  ;;  %p1099_p13 = scmp.lt.s32.totalorder %s1093_s8, %s1093_s8 }
  0x1c   :  { %p1100_p0 = por %p1099_p13, %p1098_p12 }
  0x1e   :  { %p1101_p1 = pnand %p1100_p0, %p1094_p11 }
  0x20   :  { %1104 = shalt.err (!%p1101_p1)
}
  0x21   :  { %33 = dma.hbm_to_vmem [thread:$0]  %s1477_s1, 6144, %s28_s27, [#allocation5], %s1110_s22, %s1110_s22, %s1111_s23  }
  0x22   :  { %1105 = dma.done.wait [#allocation3], 6144  }
  0x23   :  { %1106 = vsyncadd [#allocation3], 4294961152 }
  0x24   :  { %1107 = dma.done.wait [#allocation5], 6144  }
  0x25   :  { %1108 = vsyncadd [#allocation5], 4294961152  ;;  %v44_v0 = vld [vmem:[#allocation2 + $0x10] sm:$0xff]  ;;  %v42_v2 = vld [vmem:[#allocation2] sm:$0xff]  ;;  %vm784_vm0 = vcmask 130112   ;;  %vm791_vm1 = vcmask 195712  }
  0x26   :  { %v92_v1 = vld [vmem:[#allocation4 + $0x10] sm:$0xff]  ;;  %v90_v4 = vld [vmem:[#allocation4] sm:$0xff]  ;;  %v45_v5 = vld [vmem:[#allocation2 + $0x18] sm:$0xff]  ;;  %vm798_vm2 = vcmask 261312   ;;  %vm805_vm3 = vcmask 326912   ;;  %vm812_vm4 = vcmask 392512  }
  0x27   :  { %v140_v3 = vmul.f32 %v92_v1, %v44_v0  ;;  %v93_v6 = vld [vmem:[#allocation4 + $0x18] sm:$0xff]  ;;  %v138_v7 = vmul.f32 %v90_v4, %v42_v2  ;;  %v43_v8 = vld [vmem:[#allocation2 + $0x8] sm:$0xff]  ;;  %v46_v14 = vld [vmem:[#allocation2 + $0x20] sm:$0xff]  ;;  %vm819_vm5 = vcmask 458112   ;;  %vm826_vm6 = vcmask 523712  }
  0x28   :  { %v91_v9 = vld [vmem:[#allocation4 + $0x8] sm:$0xff]  ;;  %v141_v10 = vmul.f32 %v93_v6, %v45_v5  ;;  %v94_v15 = vld [vmem:[#allocation4 + $0x20] sm:$0xff]  ;;  %v49_v18 = vld [vmem:[#allocation2 + $0x38] sm:$0xff]  ;;  %vm833_vm7 = vcmask 589312   ;;  %vm840_vm8 = vcmask 654912   ;;  %vm847_vm9 = vcmask 720512  }
  0x29   :  { %190 = vadd.xlane.f32.xlu1 %v140_v3  ;;  %186 = vadd.xlane.f32.xlu0 %v138_v7  ;;  %v139_v11 = vmul.f32 %v91_v9, %v43_v8  ;;  %v47_v12 = vld [vmem:[#allocation2 + $0x28] sm:$0xff]  ;;  %v142_v17 = vmul.f32 %v94_v15, %v46_v14  ;;  %v97_v19 = vld [vmem:[#allocation4 + $0x38] sm:$0xff]  ;;  %v48_v20 = vld [vmem:[#allocation2 + $0x30] sm:$0xff]  ;;  %vm854_vm10 = vcmask 786112   ;;  %vm861_vm11 = vcmask 851712  }
  0x2a   :  { %v95_v13 = vld [vmem:[#allocation4 + $0x28] sm:$0xff]  ;;  %v96_v21 = vld [vmem:[#allocation4 + $0x30] sm:$0xff]  ;;  %v145_v22 = vmul.f32 %v97_v19, %v49_v18  ;;  %v50_v26 = vld [vmem:[#allocation2 + $0x40] sm:$0xff]  ;;  %vm868_vm12 = vcmask 917312   ;;  %vm875_vm13 = vcmask 982912   ;;  %vm882_vm14 = vcmask 1048512  }
  0x2b   :  { %v143_v16 = vmul.f32 %v95_v13, %v47_v12  ;;  %v144_v23 = vmul.f32 %v96_v21, %v48_v20  ;;  %v51_v24 = vld [vmem:[#allocation2 + $0x48] sm:$0xff]  ;;  %v98_v27 = vld [vmem:[#allocation4 + $0x40] sm:$0xff]  ;;  %v53_v30 = vld [vmem:[#allocation2 + $0x58] sm:$0xff]  ;;  %vm1042_vm15 = vcmask 1041409  }
  0x2c   :  { %v99_v25 = vld [vmem:[#allocation4 + $0x48] sm:$0xff]  ;;  %v146_v29 = vmul.f32 %v98_v27, %v50_v26  ;;  %v101_v31 = vld [vmem:[#allocation4 + $0x58] sm:$0xff]  ;;  %v52_v32 = vld [vmem:[#allocation2 + $0x50] sm:$0xff] }
  0x2d   :  { %192 = vadd.xlane.f32.xlu1 %v141_v10  ;;  %188 = vadd.xlane.f32.xlu0 %v139_v11  ;;  %v147_v28 = vmul.f32 %v99_v25, %v51_v24  ;;  %v100_v33 = vld [vmem:[#allocation4 + $0x50] sm:$0xff]  ;;  %v149_v34 = vmul.f32 %v101_v31, %v53_v30  ;;  %v55_v36 = vld [vmem:[#allocation2 + $0x68] sm:$0xff]  ;;  %v54_v38 = vld [vmem:[#allocation2 + $0x60] sm:$0xff] }
  0x2e   :  { %v148_v35 = vmul.f32 %v100_v33, %v52_v32  ;;  %v103_v37 = vld [vmem:[#allocation4 + $0x68] sm:$0xff]  ;;  %v102_v39 = vld [vmem:[#allocation4 + $0x60] sm:$0xff]  ;;  %v57_v42 = vld [vmem:[#allocation2 + $0x78] sm:$0xff] }
  0x2f   :  { %v151_v40 = vmul.f32 %v103_v37, %v55_v36  ;;  %v150_v41 = vmul.f32 %v102_v39, %v54_v38  ;;  %v105_v43 = vld [vmem:[#allocation4 + $0x78] sm:$0xff]  ;;  %v56_v44 = vld [vmem:[#allocation2 + $0x70] sm:$0xff]  ;;  %v59_v48 = vld [vmem:[#allocation2 + $0x88] sm:$0xff] }
  0x30   :  { %v104_v45 = vld [vmem:[#allocation4 + $0x70] sm:$0xff]  ;;  %v153_v46 = vmul.f32 %v105_v43, %v57_v42  ;;  %v107_v49 = vld [vmem:[#allocation4 + $0x88] sm:$0xff]  ;;  %v58_v50 = vld [vmem:[#allocation2 + $0x80] sm:$0xff] }
  0x31   :  { %196 = vadd.xlane.f32.xlu1 %v143_v16  ;;  %194 = vadd.xlane.f32.xlu0 %v142_v17  ;;  %v152_v47 = vmul.f32 %v104_v45, %v56_v44  ;;  %v106_v51 = vld [vmem:[#allocation4 + $0x80] sm:$0xff]  ;;  %v155_v52 = vmul.f32 %v107_v49, %v59_v48  ;;  %v61_v54 = vld [vmem:[#allocation2 + $0x98] sm:$0xff]  ;;  %v60_v56 = vld [vmem:[#allocation2 + $0x90] sm:$0xff] }
  0x32   :  { %v154_v53 = vmul.f32 %v106_v51, %v58_v50  ;;  %v109_v55 = vld [vmem:[#allocation4 + $0x98] sm:$0xff]  ;;  %v108_v57 = vld [vmem:[#allocation4 + $0x90] sm:$0xff]  ;;  %v63_v60 = vld [vmem:[#allocation2 + $0xa8] sm:$0xff] }
  0x33   :  { %v157_v58 = vmul.f32 %v109_v55, %v61_v54  ;;  %v156_v59 = vmul.f32 %v108_v57, %v60_v56  ;;  %v111_v61 = vld [vmem:[#allocation4 + $0xa8] sm:$0xff]  ;;  %v62_v62 = vld [vmem:[#allocation2 + $0xa0] sm:$0xff]  ;;  %v65_v2 = vld [vmem:[#allocation2 + $0xb8] sm:$0xff] }
  0x34   :  { %v110_v63 = vld [vmem:[#allocation4 + $0xa0] sm:$0xff]  ;;  %v159_v0 = vmul.f32 %v111_v61, %v63_v60  ;;  %v113_v3 = vld [vmem:[#allocation4 + $0xb8] sm:$0xff]  ;;  %v64_v4 = vld [vmem:[#allocation2 + $0xb0] sm:$0xff] }
  0x35   :  { %200 = vadd.xlane.f32.xlu1 %v145_v22  ;;  %198 = vadd.xlane.f32.xlu0 %v144_v23  ;;  %v158_v1 = vmul.f32 %v110_v63, %v62_v62  ;;  %v112_v5 = vld [vmem:[#allocation4 + $0xb0] sm:$0xff]  ;;  %v161_v6 = vmul.f32 %v113_v3, %v65_v2  ;;  %v67_v8 = vld [vmem:[#allocation2 + $0xc8] sm:$0xff]  ;;  %v66_v10 = vld [vmem:[#allocation2 + $0xc0] sm:$0xff] }
  0x36   :  { %v160_v7 = vmul.f32 %v112_v5, %v64_v4  ;;  %v115_v9 = vld [vmem:[#allocation4 + $0xc8] sm:$0xff]  ;;  %v114_v11 = vld [vmem:[#allocation4 + $0xc0] sm:$0xff]  ;;  %v69_v14 = vld [vmem:[#allocation2 + $0xd8] sm:$0xff] }
  0x37   :  { %v163_v12 = vmul.f32 %v115_v9, %v67_v8  ;;  %v162_v13 = vmul.f32 %v114_v11, %v66_v10  ;;  %v117_v15 = vld [vmem:[#allocation4 + $0xd8] sm:$0xff]  ;;  %v68_v16 = vld [vmem:[#allocation2 + $0xd0] sm:$0xff]  ;;  %v71_v20 = vld [vmem:[#allocation2 + $0xe8] sm:$0xff] }
  0x38   :  { %v116_v17 = vld [vmem:[#allocation4 + $0xd0] sm:$0xff]  ;;  %v165_v18 = vmul.f32 %v117_v15, %v69_v14  ;;  %v119_v21 = vld [vmem:[#allocation4 + $0xe8] sm:$0xff]  ;;  %v70_v22 = vld [vmem:[#allocation2 + $0xe0] sm:$0xff] }
  0x39   :  { %204 = vadd.xlane.f32.xlu1 %v147_v28  ;;  %202 = vadd.xlane.f32.xlu0 %v146_v29  ;;  %v164_v19 = vmul.f32 %v116_v17, %v68_v16  ;;  %v118_v23 = vld [vmem:[#allocation4 + $0xe0] sm:$0xff]  ;;  %v167_v24 = vmul.f32 %v119_v21, %v71_v20  ;;  %v73_v26 = vld [vmem:[#allocation2 + $0xf8] sm:$0xff]  ;;  %v72_v28 = vld [vmem:[#allocation2 + $0xf0] sm:$0xff]  ;;  %v284_v16 = vlaneseq  ;;  %v1113_v21 = vmov 0  }
  0x3a   :  { %v166_v25 = vmul.f32 %v118_v23, %v70_v22  ;;  %v121_v27 = vld [vmem:[#allocation4 + $0xf8] sm:$0xff]  ;;  %v120_v29 = vld [vmem:[#allocation4 + $0xf0] sm:$0xff]  ;;  %v75_v32 = vld [vmem:[#allocation2 + $0x108] sm:$0xff]  ;;  %1060 = vset.pattern.permute.xlu1 %v1113_v21  ;;  %1059 = vset.pattern.permute.xlu0 %v1113_v21 }
  0x3b   :  { %v169_v30 = vmul.f32 %v121_v27, %v73_v26  ;;  %v168_v31 = vmul.f32 %v120_v29, %v72_v28  ;;  %v123_v33 = vld [vmem:[#allocation4 + $0x108] sm:$0xff]  ;;  %v77_v38 = vld [vmem:[#allocation2 + $0x118] sm:$0xff]  ;;  %v1159_v17 = vshrl.u32 %v284_v16, 7 }
  0x3c   :  { %v171_v36 = vmul.f32 %v123_v33, %v75_v32  ;;  %v125_v39 = vld [vmem:[#allocation4 + $0x118] sm:$0xff]  ;;  %v79_v44 = vld [vmem:[#allocation2 + $0x128] sm:$0xff] }
  0x3d   :  { %208 = vadd.xlane.f32.xlu1 %v149_v34  ;;  %206 = vadd.xlane.f32.xlu0 %v148_v35  ;;  %v74_v34 = vld [vmem:[#allocation2 + $0x100] sm:$0xff]  ;;  %v173_v42 = vmul.f32 %v125_v39, %v77_v38  ;;  %v127_v45 = vld [vmem:[#allocation4 + $0x128] sm:$0xff]  ;;  %v81_v50 = vld [vmem:[#allocation2 + $0x138] sm:$0xff]  ;;  %v353_v22 = vsub.s32 1, %v1159_v17  ;;  %v420_v38 = vsub.s32 2, %v1159_v17 }
  0x3e   :  { %v122_v35 = vld [vmem:[#allocation4 + $0x100] sm:$0xff]  ;;  %v175_v48 = vmul.f32 %v127_v45, %v79_v44  ;;  %v129_v51 = vld [vmem:[#allocation4 + $0x138] sm:$0xff]  ;;  %v83_v56 = vld [vmem:[#allocation2 + $0x148] sm:$0xff] }
  0x3f   :  { %v170_v37 = vmul.f32 %v122_v35, %v74_v34  ;;  %v177_v54 = vmul.f32 %v129_v51, %v81_v50  ;;  %v131_v57 = vld [vmem:[#allocation4 + $0x148] sm:$0xff]  ;;  %v85_v62 = vld [vmem:[#allocation2 + $0x158] sm:$0xff] }
  0x40   :  { %v179_v60 = vmul.f32 %v131_v57, %v83_v56  ;;  %v133_v63 = vld [vmem:[#allocation4 + $0x158] sm:$0xff]  ;;  %v87_v4 = vld [vmem:[#allocation2 + $0x168] sm:$0xff] }
  0x41   :  { %212 = vadd.xlane.f32.xlu1 %v151_v40  ;;  %210 = vadd.xlane.f32.xlu0 %v150_v41  ;;  %v76_v40 = vld [vmem:[#allocation2 + $0x110] sm:$0xff]  ;;  %v181_v2 = vmul.f32 %v133_v63, %v85_v62  ;;  %v135_v5 = vld [vmem:[#allocation4 + $0x168] sm:$0xff]  ;;  %v89_v10 = vld [vmem:[#allocation2 + $0x178] sm:$0xff] }
  0x42   :  { %v124_v41 = vld [vmem:[#allocation4 + $0x110] sm:$0xff]  ;;  %v183_v8 = vmul.f32 %v135_v5, %v87_v4  ;;  %v137_v11 = vld [vmem:[#allocation4 + $0x178] sm:$0xff] }
  0x43   :  { %v172_v43 = vmul.f32 %v124_v41, %v76_v40  ;;  %v185_v14 = vmul.f32 %v137_v11, %v89_v10 }
  0x45   :  { %216 = vadd.xlane.f32.xlu1 %v153_v46  ;;  %214 = vadd.xlane.f32.xlu0 %v152_v47  ;;  %v78_v46 = vld [vmem:[#allocation2 + $0x120] sm:$0xff] }
  0x46   :  { %v126_v47 = vld [vmem:[#allocation4 + $0x120] sm:$0xff] }
  0x47   :  { %v174_v49 = vmul.f32 %v126_v47, %v78_v46 }
  0x49   :  { %220 = vadd.xlane.f32.xlu1 %v155_v52  ;;  %218 = vadd.xlane.f32.xlu0 %v154_v53  ;;  %v80_v52 = vld [vmem:[#allocation2 + $0x130] sm:$0xff] }
  0x4a   :  { %v128_v53 = vld [vmem:[#allocation4 + $0x130] sm:$0xff] }
  0x4b   :  { %v176_v55 = vmul.f32 %v128_v53, %v80_v52 }
  0x4d   :  { %224 = vadd.xlane.f32.xlu1 %v157_v58  ;;  %222 = vadd.xlane.f32.xlu0 %v156_v59  ;;  %v82_v58 = vld [vmem:[#allocation2 + $0x140] sm:$0xff] }
  0x4e   :  { %v130_v59 = vld [vmem:[#allocation4 + $0x140] sm:$0xff] }
  0x4f   :  { %v178_v61 = vmul.f32 %v130_v59, %v82_v58 }
  0x51   :  { %228 = vadd.xlane.f32.xlu1 %v159_v0  ;;  %226 = vadd.xlane.f32.xlu0 %v158_v1  ;;  %v84_v0 = vld [vmem:[#allocation2 + $0x150] sm:$0xff] }
  0x52   :  { %v132_v1 = vld [vmem:[#allocation4 + $0x150] sm:$0xff] }
  0x53   :  { %v180_v3 = vmul.f32 %v132_v1, %v84_v0 }
  0x55   :  { %232 = vadd.xlane.f32.xlu1 %v161_v6  ;;  %230 = vadd.xlane.f32.xlu0 %v160_v7  ;;  %v86_v6 = vld [vmem:[#allocation2 + $0x160] sm:$0xff] }
  0x56   :  { %v134_v7 = vld [vmem:[#allocation4 + $0x160] sm:$0xff] }
  0x57   :  { %v182_v9 = vmul.f32 %v134_v7, %v86_v6 }
  0x59   :  { %236 = vadd.xlane.f32.xlu1 %v163_v12  ;;  %234 = vadd.xlane.f32.xlu0 %v162_v13  ;;  %v88_v12 = vld [vmem:[#allocation2 + $0x170] sm:$0xff] }
  0x5a   :  { %v136_v13 = vld [vmem:[#allocation4 + $0x170] sm:$0xff] }
  0x5b   :  { %v184_v15 = vmul.f32 %v136_v13, %v88_v12 }
  0x5d   :  { %240 = vadd.xlane.f32.xlu1 %v165_v18  ;;  %238 = vadd.xlane.f32.xlu0 %v164_v19  ;;  %v286_v18 = vsub.s32 0, %v1159_v17  ;;  %v282_v19 = vld [vmem:[%s1478_s2] sm:$0x7] }
  0x5e   :  { %v354_v23 = vrot.slane %v282_v19, %v353_v22  ;;  %v421_v41 = vrot.slane %v282_v19, %v420_v38 }
  0x5f   :  { %v287_v20 = vrot.slane %v282_v19, %v286_v18 }
  0x61   :  { %244 = vadd.xlane.f32.xlu1 %v167_v24  ;;  %242 = vadd.xlane.f32.xlu0 %v166_v25 }
  0x65   :  { %248 = vadd.xlane.f32.xlu1 %v169_v30  ;;  %246 = vadd.xlane.f32.xlu0 %v168_v31 }
  0x69   :  { %252 = vadd.xlane.f32.xlu1 %v171_v36  ;;  %250 = vadd.xlane.f32.xlu0 %v170_v37 }
  0x6d   :  { %256 = vadd.xlane.f32.xlu1 %v173_v42  ;;  %254 = vadd.xlane.f32.xlu0 %v172_v43 }
  0x71   :  { %260 = vadd.xlane.f32.xlu1 %v175_v48  ;;  %258 = vadd.xlane.f32.xlu0 %v174_v49 }
  0x75   :  { %264 = vadd.xlane.f32.xlu1 %v177_v54  ;;  %262 = vadd.xlane.f32.xlu0 %v176_v55 }
  0x79   :  { %268 = vadd.xlane.f32.xlu1 %v179_v60  ;;  %266 = vadd.xlane.f32.xlu0 %v178_v61 }
  0x7d   :  { %272 = vadd.xlane.f32.xlu1 %v181_v2  ;;  %270 = vadd.xlane.f32.xlu0 %v180_v3 }
  0x81   :  { %276 = vadd.xlane.f32.xlu1 %v183_v8  ;;  %274 = vadd.xlane.f32.xlu0 %v182_v9 }
  0x85   :  { %280 = vadd.xlane.f32.xlu1 %v185_v14  ;;  %278 = vadd.xlane.f32.xlu0 %v184_v15 }
  0x96   :  { %293 = vbcast.lane.b32.xlu1 %v287_v20, 264 }
  0x9a   :  { %297 = vbcast.lane.b32.xlu1 %v287_v20, 272 }
  0x9b   :  { %289 = vbcast.lane.b32.xlu0 %v287_v20, 256 }
  0x9e   :  { %301 = vbcast.lane.b32.xlu1 %v287_v20, 280 }
  0x9f   :  { %305 = vbcast.lane.b32.xlu0 %v287_v20, 288 }
  0xa2   :  { %309 = vbcast.lane.b32.xlu1 %v287_v20, 296 }
  0xa3   :  { %313 = vbcast.lane.b32.xlu0 %v287_v20, 304 }
  0xa6   :  { %317 = vbcast.lane.b32.xlu1 %v287_v20, 312 }
  0xa7   :  { %321 = vbcast.lane.b32.xlu0 %v287_v20, 320 }
  0xaa   :  { %325 = vbcast.lane.b32.xlu1 %v287_v20, 328 }
  0xab   :  { %329 = vbcast.lane.b32.xlu0 %v287_v20, 336 }
  0xae   :  { %333 = vbcast.lane.b32.xlu1 %v287_v20, 344 }
  0xaf   :  { %337 = vbcast.lane.b32.xlu0 %v287_v20, 352 }
  0xb2   :  { %341 = vbcast.lane.b32.xlu1 %v287_v20, 360 }
  0xb3   :  { %345 = vbcast.lane.b32.xlu0 %v287_v20, 368 }
  0xb6   :  { %v1166_v24 = vpop.xlane.xlu1 %190  ;;  %349 = vbcast.lane.b32.xlu1 %v287_v20, 376  ;;  %v1168_v25 = vpop.xlane.xlu0 %186 }
  0xb7   :  { %356 = vbcast.lane.b32.xlu0 %v354_v23, 256 }
  0xba   :  { %v1170_v26 = vpop.xlane.xlu1 %192  ;;  %360 = vbcast.lane.b32.xlu1 %v354_v23, 264  ;;  %v1172_v27 = vpop.xlane.xlu0 %188 }
  0xbb   :  { %364 = vbcast.lane.b32.xlu0 %v354_v23, 272 }
  0xbe   :  { %v1174_v28 = vpop.xlane.xlu1 %196  ;;  %368 = vbcast.lane.b32.xlu1 %v354_v23, 280  ;;  %v1176_v29 = vpop.xlane.xlu0 %194 }
  0xbf   :  { %372 = vbcast.lane.b32.xlu0 %v354_v23, 288 }
  0xc2   :  { %v1178_v30 = vpop.xlane.xlu1 %200  ;;  %376 = vbcast.lane.b32.xlu1 %v354_v23, 296  ;;  %v1180_v31 = vpop.xlane.xlu0 %198 }
  0xc3   :  { %380 = vbcast.lane.b32.xlu0 %v354_v23, 304 }
  0xc6   :  { %v1182_v32 = vpop.xlane.xlu1 %204  ;;  %384 = vbcast.lane.b32.xlu1 %v354_v23, 312  ;;  %v1184_v33 = vpop.xlane.xlu0 %202 }
  0xc7   :  { %388 = vbcast.lane.b32.xlu0 %v354_v23, 320 }
  0xca   :  { %v1186_v34 = vpop.xlane.xlu1 %208  ;;  %392 = vbcast.lane.b32.xlu1 %v354_v23, 328  ;;  %v1188_v35 = vpop.xlane.xlu0 %206 }
  0xcb   :  { %396 = vbcast.lane.b32.xlu0 %v354_v23, 336 }
  0xce   :  { %v1190_v36 = vpop.xlane.xlu1 %212  ;;  %400 = vbcast.lane.b32.xlu1 %v354_v23, 344  ;;  %v1192_v37 = vpop.xlane.xlu0 %210 }
  0xcf   :  { %404 = vbcast.lane.b32.xlu0 %v354_v23, 352 }
  0xd2   :  { %v1195_v39 = vpop.xlane.xlu1 %216  ;;  %408 = vbcast.lane.b32.xlu1 %v354_v23, 360  ;;  %v1197_v40 = vpop.xlane.xlu0 %214 }
  0xd3   :  { %412 = vbcast.lane.b32.xlu0 %v354_v23, 368 }
  0xd6   :  { %v1199_v42 = vpop.xlane.xlu1 %220  ;;  %416 = vbcast.lane.b32.xlu1 %v354_v23, 376  ;;  %v1201_v43 = vpop.xlane.xlu0 %218 }
  0xd7   :  { %423 = vbcast.lane.b32.xlu0 %v421_v41, 256 }
  0xda   :  { %v1203_v44 = vpop.xlane.xlu1 %224  ;;  %427 = vbcast.lane.b32.xlu1 %v421_v41, 264  ;;  %v1205_v45 = vpop.xlane.xlu0 %222 }
  0xdb   :  { %431 = vbcast.lane.b32.xlu0 %v421_v41, 272 }
  0xde   :  { %v1207_v46 = vpop.xlane.xlu1 %228  ;;  %435 = vbcast.lane.b32.xlu1 %v421_v41, 280  ;;  %v1209_v47 = vpop.xlane.xlu0 %226 }
  0xdf   :  { %439 = vbcast.lane.b32.xlu0 %v421_v41, 288 }
  0xe2   :  { %v1211_v48 = vpop.xlane.xlu1 %232  ;;  %443 = vbcast.lane.b32.xlu1 %v421_v41, 296  ;;  %v1213_v49 = vpop.xlane.xlu0 %230 }
  0xe3   :  { %447 = vbcast.lane.b32.xlu0 %v421_v41, 304 }
  0xe6   :  { %v1215_v50 = vpop.xlane.xlu1 %236  ;;  %451 = vbcast.lane.b32.xlu1 %v421_v41, 312  ;;  %v1217_v51 = vpop.xlane.xlu0 %234 }
  0xe7   :  { %455 = vbcast.lane.b32.xlu0 %v421_v41, 320 }
  0xea   :  { %v1219_v52 = vpop.xlane.xlu1 %240  ;;  %459 = vbcast.lane.b32.xlu1 %v421_v41, 328  ;;  %v1221_v53 = vpop.xlane.xlu0 %238 }
  0xeb   :  { %463 = vbcast.lane.b32.xlu0 %v421_v41, 336 }
  0xee   :  { %v1223_v54 = vpop.xlane.xlu1 %244  ;;  %467 = vbcast.lane.b32.xlu1 %v421_v41, 344  ;;  %v1225_v55 = vpop.xlane.xlu0 %242 }
  0xef   :  { %471 = vbcast.lane.b32.xlu0 %v421_v41, 352 }
  0xf2   :  { %v1227_v56 = vpop.xlane.xlu1 %248  ;;  %475 = vbcast.lane.b32.xlu1 %v421_v41, 360  ;;  %v1229_v57 = vpop.xlane.xlu0 %246 }
  0xf3   :  { %479 = vbcast.lane.b32.xlu0 %v421_v41, 368 }
  0xf6   :  { %v1231_v58 = vpop.xlane.xlu1 %252  ;;  %483 = vbcast.lane.b32.xlu1 %v421_v41, 376  ;;  %v1233_v59 = vpop.xlane.xlu0 %250 }
  0xfa   :  { %v1235_v60 = vpop.xlane.xlu1 %256  ;;  %v1237_v61 = vpop.xlane.xlu0 %254 }
  0xfe   :  { %v1239_v62 = vpop.xlane.xlu1 %260  ;;  %v1241_v63 = vpop.xlane.xlu0 %258 }
 0x102   :  { %v1243_v0 = vpop.xlane.xlu1 %264  ;;  %v1245_v1 = vpop.xlane.xlu0 %262 }
 0x106   :  { %v1247_v2 = vpop.xlane.xlu1 %268  ;;  %v1249_v3 = vpop.xlane.xlu0 %266 }
 0x10a   :  { %v1251_v4 = vpop.xlane.xlu1 %272  ;;  %v1253_v5 = vpop.xlane.xlu0 %270 }
 0x10e   :  { %v1255_v6 = vpop.xlane.xlu1 %276  ;;  %v1257_v7 = vpop.xlane.xlu0 %274 }
 0x112   :  { %v1259_v8 = vpop.xlane.xlu1 %280  ;;  %v1261_v9 = vpop.xlane.xlu0 %278 }
 0x116   :  { %v294_v10 = vpop.permute.xlu1 %293  ;;  %v290_v12 = vpop.permute.xlu0 %289 }
 0x117   :  { %v534_v11 = vadd.f32 %v294_v10, %v1172_v27  ;;  %v533_v13 = vadd.f32 %v290_v12, %v1168_v25 }
 0x119   :  { %633 = vperm.xlu1 %1060, %v534_v11   ;;  %630 = vperm.xlu0 %1059, %v533_v13  }
 0x11a   :  { %v298_v14 = vpop.permute.xlu1 %297  ;;  %v306_v18 = vpop.permute.xlu0 %305 }
 0x11b   :  { %v535_v15 = vadd.f32 %v298_v14, %v1166_v24  ;;  %v537_v20 = vadd.f32 %v306_v18, %v1176_v29 }
 0x11d   :  { %636 = vperm.xlu1 %1060, %v535_v15  }
 0x11e   :  { %v302_v19 = vpop.permute.xlu1 %301  ;;  %v314_v22 = vpop.permute.xlu0 %313 }
 0x11f   :  { %v536_v21 = vadd.f32 %v302_v19, %v1170_v26  ;;  %v539_v27 = vadd.f32 %v314_v22, %v1180_v31 }
 0x121   :  { %639 = vperm.xlu0 %1059, %v536_v21   ;;  %642 = vperm.xlu1 %1060, %v537_v20  }
 0x122   :  { %v310_v23 = vpop.permute.xlu1 %309  ;;  %v322_v38 = vpop.permute.xlu0 %321 }
 0x123   :  { %v538_v25 = vadd.f32 %v310_v23, %v1174_v28  ;;  %v541_v24 = vadd.f32 %v322_v38, %v1184_v33 }
 0x125   :  { %645 = vperm.xlu0 %1059, %v538_v25   ;;  %648 = vperm.xlu1 %1060, %v539_v27  }
 0x126   :  { %v318_v41 = vpop.permute.xlu1 %317  ;;  %v330_v11 = vpop.permute.xlu0 %329 }
 0x127   :  { %v540_v10 = vadd.f32 %v318_v41, %v1178_v30  ;;  %v543_v29 = vadd.f32 %v330_v11, %v1188_v35 }
 0x129   :  { %651 = vperm.xlu0 %1059, %v540_v10   ;;  %654 = vperm.xlu1 %1060, %v541_v24  }
 0x12a   :  { %v326_v26 = vpop.permute.xlu1 %325  ;;  %v338_v13 = vpop.permute.xlu0 %337 }
 0x12b   :  { %v542_v12 = vadd.f32 %v326_v26, %v1182_v32  ;;  %v545_v31 = vadd.f32 %v338_v13, %v1192_v37 }
 0x12d   :  { %657 = vperm.xlu0 %1059, %v542_v12   ;;  %660 = vperm.xlu1 %1060, %v543_v29  }
 0x12e   :  { %v334_v28 = vpop.permute.xlu1 %333  ;;  %v346_v15 = vpop.permute.xlu0 %345 }
 0x12f   :  { %v544_v14 = vadd.f32 %v334_v28, %v1186_v34  ;;  %v547_v33 = vadd.f32 %v346_v15, %v1197_v40 }
 0x131   :  { %663 = vperm.xlu0 %1059, %v544_v14   ;;  %666 = vperm.xlu1 %1060, %v545_v31  }
 0x132   :  { %v342_v30 = vpop.permute.xlu1 %341  ;;  %v357_v19 = vpop.permute.xlu0 %356 }
 0x133   :  { %v546_v18 = vadd.f32 %v342_v30, %v1190_v36  ;;  %v549_v35 = vadd.f32 %v357_v19, %v1201_v43 }
 0x135   :  { %669 = vperm.xlu0 %1059, %v546_v18   ;;  %672 = vperm.xlu1 %1060, %v547_v33  }
 0x136   :  { %v350_v32 = vpop.permute.xlu1 %349  ;;  %v365_v21 = vpop.permute.xlu0 %364 }
 0x137   :  { %v548_v20 = vadd.f32 %v350_v32, %v1195_v39  ;;  %v551_v37 = vadd.f32 %v365_v21, %v1205_v45 }
 0x139   :  { %675 = vperm.xlu0 %1059, %v548_v20   ;;  %678 = vperm.xlu1 %1060, %v549_v35  }
 0x13a   :  { %v361_v34 = vpop.permute.xlu1 %360  ;;  %v373_v23 = vpop.permute.xlu0 %372 }
 0x13b   :  { %v550_v22 = vadd.f32 %v361_v34, %v1199_v42  ;;  %v553_v40 = vadd.f32 %v373_v23, %v1209_v47 }
 0x13d   :  { %681 = vperm.xlu0 %1059, %v550_v22   ;;  %684 = vperm.xlu1 %1060, %v551_v37  }
 0x13e   :  { %v369_v36 = vpop.permute.xlu1 %368  ;;  %v381_v25 = vpop.permute.xlu0 %380 }
 0x13f   :  { %v552_v27 = vadd.f32 %v369_v36, %v1203_v44  ;;  %v555_v43 = vadd.f32 %v381_v25, %v1213_v49 }
 0x141   :  { %687 = vperm.xlu0 %1059, %v552_v27   ;;  %690 = vperm.xlu1 %1060, %v553_v40  }
 0x142   :  { %v377_v39 = vpop.permute.xlu1 %376  ;;  %v389_v41 = vpop.permute.xlu0 %388 }
 0x143   :  { %v554_v38 = vadd.f32 %v377_v39, %v1207_v46  ;;  %v557_v45 = vadd.f32 %v389_v41, %v1217_v51 }
 0x145   :  { %693 = vperm.xlu0 %1059, %v554_v38   ;;  %696 = vperm.xlu1 %1060, %v555_v43  }
 0x146   :  { %v385_v42 = vpop.permute.xlu1 %384  ;;  %v397_v10 = vpop.permute.xlu0 %396 }
 0x147   :  { %v556_v24 = vadd.f32 %v385_v42, %v1211_v48  ;;  %v559_v47 = vadd.f32 %v397_v10, %v1221_v53 }
 0x149   :  { %699 = vperm.xlu0 %1059, %v556_v24   ;;  %702 = vperm.xlu1 %1060, %v557_v45  }
 0x14a   :  { %v393_v44 = vpop.permute.xlu1 %392  ;;  %v405_v26 = vpop.permute.xlu0 %404 }
 0x14b   :  { %v558_v11 = vadd.f32 %v393_v44, %v1215_v50 }
 0x14d   :  { %705 = vperm.xlu0 %1059, %v558_v11   ;;  %708 = vperm.xlu1 %1060, %v559_v47  }
 0x14e   :  { %v401_v46 = vpop.permute.xlu1 %400  ;;  %v413_v29 = vpop.permute.xlu0 %412 }
 0x14f   :  { %v560_v49 = vadd.f32 %v401_v46, %v1219_v52 }
 0x151   :  { %711 = vperm.xlu0 %1059, %v560_v49  }
 0x152   :  { %v409_v12 = vpop.permute.xlu1 %408  ;;  %v424_v51 = vpop.permute.xlu0 %423 }
 0x153   :  { %v565_v48 = vadd.f32 %v424_v51, %v1233_v59  ;;  %v562_v37 = vadd.f32 %v409_v12, %v1223_v54 }
 0x155   :  { %726 = vperm.xlu1 %1060, %v565_v48  }
 0x156   :  { %v417_v13 = vpop.permute.xlu1 %416  ;;  %v432_v28 = vpop.permute.xlu0 %431 }
 0x157   :  { %v567_v31 = vadd.f32 %v432_v28, %v1237_v61 }
 0x159   :  { %732 = vperm.xlu1 %1060, %v567_v31  }
 0x15a   :  { %v428_v53 = vpop.permute.xlu1 %427  ;;  %v440_v14 = vpop.permute.xlu0 %439 }
 0x15b   :  { %v566_v50 = vadd.f32 %v428_v53, %v1231_v58  ;;  %v569_v15 = vadd.f32 %v440_v14, %v1241_v63 }
 0x15d   :  { %729 = vperm.xlu0 %1059, %v566_v50   ;;  %738 = vperm.xlu1 %1060, %v569_v15  }
 0x15e   :  { %v436_v52 = vpop.permute.xlu1 %435  ;;  %v448_v33 = vpop.permute.xlu0 %447 }
 0x15f   :  { %v568_v30 = vadd.f32 %v436_v52, %v1235_v60  ;;  %v571_v59 = vadd.f32 %v448_v33, %v1245_v1 }
 0x161   :  { %735 = vperm.xlu0 %1059, %v568_v30   ;;  %744 = vperm.xlu1 %1060, %v571_v59  }
 0x162   :  { %v444_v18 = vpop.permute.xlu1 %443  ;;  %v456_v19 = vpop.permute.xlu0 %455 }
 0x163   :  { %v570_v61 = vadd.f32 %v444_v18, %v1239_v62  ;;  %v573_v32 = vadd.f32 %v456_v19, %v1249_v3  ;;  %v561_v62 = vadd.f32 %v405_v26, %v1225_v55  ;;  %v564_v55 = vadd.f32 %v417_v13, %v1227_v56 }
 0x165   :  { %741 = vperm.xlu0 %1059, %v570_v61   ;;  %750 = vperm.xlu1 %1060, %v573_v32  }
 0x166   :  { %v452_v58 = vpop.permute.xlu1 %451  ;;  %v464_v35 = vpop.permute.xlu0 %463 }
 0x167   :  { %v572_v63 = vadd.f32 %v452_v58, %v1243_v0  ;;  %v575_v20 = vadd.f32 %v464_v35, %v1253_v5  ;;  %v563_v5 = vadd.f32 %v413_v29, %v1229_v57 }
 0x169   :  { %747 = vperm.xlu0 %1059, %v572_v63   ;;  %756 = vperm.xlu1 %1060, %v575_v20  }
 0x16a   :  { %v460_v60 = vpop.permute.xlu1 %459  ;;  %v472_v3 = vpop.permute.xlu0 %471 }
 0x16b   :  { %v574_v1 = vadd.f32 %v460_v60, %v1247_v2  ;;  %v577_v0 = vadd.f32 %v472_v3, %v1257_v7  ;;  %v1312_v7 = vand.u32 127, %v284_v16 }
 0x16d   :  { %753 = vperm.xlu0 %1059, %v574_v1   ;;  %v779_v57 = vadd.s32 4294967288, %v1312_v7  ;;  %v786_v40 = vadd.s32 4294967280, %v1312_v7  ;;  %v1321_v56 = vsub.s32 %v1312_v7, %v1159_v17  ;;  %v800_v16 = vadd.s32 4294967264, %v1312_v7 }
 0x16e   :  { %v468_v21 = vpop.permute.xlu1 %467  ;;  %v480_v23 = vpop.permute.xlu0 %479  ;;  %v793_v39 = vadd.s32 4294967272, %v1312_v7  ;;  %v814_v42 = vadd.s32 4294967248, %v1312_v7  ;;  %v807_v44 = vadd.s32 4294967256, %v1312_v7  ;;  %v828_v49 = vadd.s32 4294967232, %v1312_v7 }
 0x16f   :  { %v576_v34 = vadd.f32 %v468_v21, %v1251_v4  ;;  %v579_v4 = vadd.f32 %v480_v23, %v1261_v9  ;;  %v1325_v25 = vsub.s32 %v786_v40, %v1159_v17  ;;  %v1334_v24 = vsub.s32 %v800_v16, %v1159_v17 }
 0x170   :  { %v1337_v10 = vsub.s32 %v793_v39, %v1159_v17  ;;  %v1342_v46 = vsub.s32 %v814_v42, %v1159_v17  ;;  %v1348_v51 = vsub.s32 %v807_v44, %v1159_v17  ;;  %v821_v48 = vadd.s32 4294967240, %v1312_v7 }
 0x171   :  { %714 = vperm.xlu0 %1059, %v561_v62   ;;  %759 = vperm.xlu1 %1060, %v576_v34   ;;  %v1354_v50 = vsub.s32 %v828_v49, %v1159_v17  ;;  %v842_v14 = vadd.s32 4294967216, %v1312_v7  ;;  %v835_v33 = vadd.s32 4294967224, %v1312_v7  ;;  %v856_v58 = vadd.s32 4294967200, %v1312_v7 }
 0x172   :  { %v476_v22 = vpop.permute.xlu1 %475  ;;  %v1360_v30 = vsub.s32 %v821_v48, %v1159_v17  ;;  %v849_v60 = vadd.s32 4294967208, %v1312_v7 }
 0x173   :  { %v578_v2 = vadd.f32 %v476_v22, %v1255_v6  ;;  %v1316_v6 = vsub.s32 %v779_v57, %v1159_v17  ;;  %v1366_v32 = vsub.s32 %v842_v14, %v1159_v17  ;;  %v1372_v20 = vsub.s32 %v835_v33, %v1159_v17 }
 0x174   :  { %v1378_v3 = vsub.s32 %v856_v58, %v1159_v17  ;;  %v1383_v22 = vsub.s32 %v849_v60, %v1159_v17 }
 0x175   :  { %717 = vperm.xlu0 %1059, %v562_v37   ;;  %762 = vperm.xlu1 %1060, %v577_v0  }
 0x176   :  { %v484_v36 = vpop.permute.xlu1 %483 }
 0x177   :  { %v580_v54 = vadd.f32 %v484_v36, %v1259_v8 }
 0x179   :  { %720 = vperm.xlu0 %1059, %v563_v5   ;;  %765 = vperm.xlu1 %1060, %v578_v2   ;;  %v863_v5 = vadd.s32 4294967192, %v1312_v7 }
 0x17b   :  { %v1391_v57 = vsub.s32 %v863_v5, %v1159_v17 }
 0x17d   :  { %723 = vperm.xlu0 %1059, %v564_v55   ;;  %768 = vperm.xlu1 %1060, %v579_v4  }
 0x181   :  { %771 = vperm.xlu0 %1059, %v580_v54  }
 0x198   :  { %v634_v9 = vpop.permute.xlu1 %633  ;;  %v631_v8 = vpop.permute.xlu0 %630 }
 0x199   :  { %v783_v27 = vrot.slane %v634_v9, %v1316_v6  ;;  %v778_v43 = vrot.slane %v631_v8, %v1321_v56 }
 0x19b   :  { %v785_v38 = vsel %vm784_vm0, %v783_v27, %v778_v43 }
 0x19c   :  { %v637_v41 = vpop.permute.xlu1 %636 }
 0x19d   :  { %v790_v45 = vrot.slane %v637_v41, %v1325_v25 }
 0x19f   :  { %v792_v47 = vsel %vm791_vm1, %v790_v45, %v785_v38 }
 0x1a0   :  { %v643_v11 = vpop.permute.xlu1 %642  ;;  %v640_v26 = vpop.permute.xlu0 %639 }
 0x1a1   :  { %v804_v29 = vrot.slane %v643_v11, %v1334_v24  ;;  %v797_v12 = vrot.slane %v640_v26, %v1337_v10 }
 0x1a3   :  { %v799_v13 = vsel %vm798_vm2, %v797_v12, %v792_v47 }
 0x1a4   :  { %v649_v28 = vpop.permute.xlu1 %648  ;;  %v806_v31 = vsel %vm805_vm3, %v804_v29, %v799_v13  ;;  %v646_v53 = vpop.permute.xlu0 %645 }
 0x1a5   :  { %v818_v15 = vrot.slane %v649_v28, %v1342_v46  ;;  %v811_v52 = vrot.slane %v646_v53, %v1348_v51 }
 0x1a7   :  { %v813_v59 = vsel %vm812_vm4, %v811_v52, %v806_v31 }
 0x1a8   :  { %v655_v18 = vpop.permute.xlu1 %654  ;;  %v820_v61 = vsel %vm819_vm5, %v818_v15, %v813_v59  ;;  %v652_v19 = vpop.permute.xlu0 %651 }
 0x1a9   :  { %v832_v63 = vrot.slane %v655_v18, %v1354_v50  ;;  %v825_v35 = vrot.slane %v652_v19, %v1360_v30 }
 0x1ab   :  { %v827_v1 = vsel %vm826_vm6, %v825_v35, %v820_v61 }
 0x1ac   :  { %v661_v21 = vpop.permute.xlu1 %660  ;;  %v834_v62 = vsel %vm833_vm7, %v832_v63, %v827_v1  ;;  %v658_v34 = vpop.permute.xlu0 %657 }
 0x1ad   :  { %v846_v37 = vrot.slane %v661_v21, %v1366_v32  ;;  %v839_v0 = vrot.slane %v658_v34, %v1372_v20 }
 0x1af   :  { %v841_v2 = vsel %vm840_vm8, %v839_v0, %v834_v62 }
 0x1b0   :  { %v667_v23 = vpop.permute.xlu1 %666  ;;  %v848_v55 = vsel %vm847_vm9, %v846_v37, %v841_v2  ;;  %v664_v4 = vpop.permute.xlu0 %663 }
 0x1b1   :  { %v860_v36 = vrot.slane %v667_v23, %v1378_v3  ;;  %v853_v54 = vrot.slane %v664_v4, %v1383_v22 }
 0x1b3   :  { %v855_v40 = vsel %vm854_vm10, %v853_v54, %v848_v55 }
 0x1b4   :  { %v1394_v9 = vpop.permute.xlu1 %672  ;;  %v862_v27 = vsel %vm861_vm11, %v860_v36, %v855_v40  ;;  %v670_v8 = vpop.permute.xlu0 %669 }
 0x1b5   :  { %v867_v16 = vrot.slane %v670_v8, %v1391_v57 }
 0x1b7   :  { %v1399_v39 = vsel %vm868_vm12, %v867_v16, %v862_v27 }
 0x1b8   :  { %v679_v43 = vpop.permute.xlu1 %678  ;;  %v1401_v38 = vpop.permute.xlu0 %675 }
 0x1b9   :  { %v887_v59 = vrot.slane %v679_v43, %v1321_v56 }
 0x1bc   :  { %v685_v41 = vpop.permute.xlu1 %684  ;;  %v682_v42 = vpop.permute.xlu0 %681 }
 0x1bd   :  { %v891_v52 = vrot.slane %v682_v42, %v1316_v6  ;;  %v896_v61 = vrot.slane %v685_v41, %v1325_v25 }
 0x1bf   :  { %v892_v58 = vsel %vm784_vm0, %v891_v52, %v887_v59 }
 0x1c0   :  { %v691_v45 = vpop.permute.xlu1 %690  ;;  %v688_v44 = vpop.permute.xlu0 %687  ;;  %v897_v21 = vsel %vm791_vm1, %v896_v61, %v892_v58 }
 0x1c1   :  { %v901_v63 = vrot.slane %v688_v44, %v1337_v10  ;;  %v906_v1 = vrot.slane %v691_v45, %v1334_v24 }
 0x1c3   :  { %v902_v37 = vsel %vm798_vm2, %v901_v63, %v897_v21 }
 0x1c4   :  { %v697_v47 = vpop.permute.xlu1 %696  ;;  %v694_v11 = vpop.permute.xlu0 %693  ;;  %v907_v55 = vsel %vm805_vm3, %v906_v1, %v902_v37 }
 0x1c5   :  { %v911_v0 = vrot.slane %v694_v11, %v1348_v51  ;;  %v870_v11 = vadd.s32 4294967184, %v1312_v7 }
 0x1c8   :  { %v703_v26 = vpop.permute.xlu1 %702  ;;  %v700_v49 = vpop.permute.xlu0 %699 }
 0x1c9   :  { %v921_v54 = vrot.slane %v700_v49, %v1360_v30  ;;  %v926_v16 = vrot.slane %v703_v26, %v1354_v50  ;;  %v877_v49 = vadd.s32 4294967176, %v1312_v7 }
 0x1cc   :  { %v1403_v29 = vpop.permute.xlu1 %708  ;;  %v706_v12 = vpop.permute.xlu0 %705 }
 0x1cd   :  { %v931_v45 = vrot.slane %v706_v12, %v1372_v20 }
 0x1d0   :  { %v1405_v13 = vpop.permute.xlu0 %711 }
 0x1d4   :  { %v727_v48 = vpop.permute.xlu1 %726 }
 0x1d5   :  { %v966_v60 = vrot.slane %v727_v48, %v1321_v56  ;;  %v916_v56 = vrot.slane %v697_v47, %v1342_v46  ;;  %v936_v48 = vrot.slane %v1403_v29, %v1366_v32  ;;  %v880_v29 = vsub.s32 %v877_v49, %v1159_v17 }
 0x1d8   :  { %v733_v28 = vpop.permute.xlu1 %732 }
 0x1dc   :  { %v730_v31 = vpop.permute.xlu0 %729  ;;  %v739_v53 = vpop.permute.xlu1 %738 }
 0x1dd   :  { %v970_v19 = vrot.slane %v730_v31, %v1316_v6  ;;  %v975_v6 = vrot.slane %v733_v28, %v1325_v25  ;;  %v985_v40 = vrot.slane %v739_v53, %v1334_v24 }
 0x1df   :  { %v971_v62 = vsel %vm784_vm0, %v970_v19, %v966_v60  ;;  %vm1044_vm0 = vcmask 1042434  }
 0x1e0   :  { %v736_v14 = vpop.permute.xlu0 %735  ;;  %v745_v15 = vpop.permute.xlu1 %744  ;;  %v976_v23 = vsel %vm791_vm1, %v975_v6, %v971_v62  ;;  %v881_v62 = vrot.slane %v1401_v38, %v880_v29 }
 0x1e1   :  { %v980_v34 = vrot.slane %v736_v14, %v1337_v10  ;;  %v912_v10 = vsel %vm812_vm4, %v911_v0, %v907_v55  ;;  %v995_v44 = vrot.slane %v745_v15, %v1342_v46  ;;  %v941_v46 = vrot.slane %v1405_v13, %v1383_v22 }
 0x1e2   :  { %v917_v43 = vsel %vm819_vm5, %v916_v56, %v912_v10  ;;  %v873_v15 = vsub.s32 %v870_v11, %v1159_v17 }
 0x1e3   :  { %v981_v4 = vsel %vm798_vm2, %v980_v34, %v976_v23 }
 0x1e4   :  { %v742_v33 = vpop.permute.xlu0 %741  ;;  %v751_v18 = vpop.permute.xlu1 %750  ;;  %v986_v8 = vsel %vm805_vm3, %v985_v40, %v981_v4 }
 0x1e5   :  { %v990_v36 = vrot.slane %v742_v33, %v1348_v51  ;;  %v922_v51 = vsel %vm826_vm6, %v921_v54, %v917_v43  ;;  %v1005_v53 = vrot.slane %v751_v18, %v1354_v50 }
 0x1e6   :  { %v927_v28 = vsel %vm833_vm7, %v926_v16, %v922_v51 }
 0x1e7   :  { %v991_v41 = vsel %vm812_vm4, %v990_v36, %v986_v8  ;;  %v932_v12 = vsel %vm840_vm8, %v931_v45, %v927_v28 }
 0x1e8   :  { %v748_v35 = vpop.permute.xlu0 %747  ;;  %v757_v5 = vpop.permute.xlu1 %756  ;;  %v996_v26 = vsel %vm819_vm5, %v995_v44, %v991_v41 }
 0x1e9   :  { %v1000_v42 = vrot.slane %v748_v35, %v1360_v30  ;;  %v1015_v18 = vrot.slane %v757_v5, %v1366_v32  ;;  %v874_v35 = vrot.slane %v1394_v9, %v873_v15 }
 0x1eb   :  { %v1001_v30 = vsel %vm826_vm6, %v1000_v42, %v996_v26 }
 0x1ec   :  { %v754_v2 = vpop.permute.xlu0 %753  ;;  %v1006_v33 = vsel %vm833_vm7, %v1005_v53, %v1001_v30 }
 0x1ed   :  { %v1010_v31 = vrot.slane %v754_v2, %v1372_v20  ;;  %v937_v20 = vsel %vm847_vm9, %v936_v48, %v932_v12 }
 0x1ee   :  { %v942_v50 = vsel %vm854_vm10, %v941_v46, %v937_v20 }
 0x1ef   :  { %v1011_v61 = vsel %vm840_vm8, %v1010_v31, %v1006_v33 }
 0x1f0   :  { %v760_v27 = vpop.permute.xlu1 %759  ;;  %v715_v25 = vpop.permute.xlu0 %714 }
 0x1f1   :  { %v946_v52 = vrot.slane %v715_v25, %v1378_v3  ;;  %v1020_v13 = vrot.slane %v760_v27, %v1383_v22  ;;  %v1016_v22 = vsel %vm847_vm9, %v1015_v18, %v1011_v61 }
 0x1f3   :  { %v947_v60 = vsel %vm861_vm11, %v946_v52, %v942_v50  ;;  %v1021_v32 = vsel %vm854_vm10, %v1020_v13, %v1016_v22 }
 0x1f4   :  { %v763_v47 = vpop.permute.xlu1 %762  ;;  %v718_v24 = vpop.permute.xlu0 %717 }
 0x1f5   :  { %v951_v59 = vrot.slane %v718_v24, %v1391_v57  ;;  %v1025_v58 = vrot.slane %v763_v47, %v1378_v3 }
 0x1f7   :  { %v952_v34 = vsel %vm868_vm12, %v951_v59, %v947_v60  ;;  %v1026_v0 = vsel %vm861_vm11, %v1025_v58, %v1021_v32 }
 0x1f8   :  { %v766_v14 = vpop.permute.xlu1 %765  ;;  %v721_v7 = vpop.permute.xlu0 %720 }
 0x1f9   :  { %v956_v19 = vrot.slane %v721_v7, %v873_v15  ;;  %v1030_v1 = vrot.slane %v766_v14, %v1391_v57  ;;  %v876_v57 = vsel %vm875_vm13, %v874_v35, %v1399_v39 }
 0x1fa   :  { %v883_v2 = vsel %vm882_vm14, %v881_v62, %v876_v57 }
 0x1fb   :  { %v957_v3 = vsel %vm875_vm13, %v956_v19, %v952_v34  ;;  %v1031_v38 = vsel %vm868_vm12, %v1030_v1, %v1026_v0 }
 0x1fc   :  { %v769_v63 = vpop.permute.xlu1 %768  ;;  %v724_v17 = vpop.permute.xlu0 %723 }
 0x1fd   :  { %v961_v21 = vrot.slane %v724_v17, %v880_v29  ;;  %v1035_v37 = vrot.slane %v769_v63, %v873_v15 }
 0x1ff   :  { %v962_v9 = vsel %vm882_vm14, %v961_v21, %v957_v3  ;;  %v1036_v23 = vsel %vm875_vm13, %v1035_v37, %v1031_v38 }
 0x200   :  { %v772_v6 = vpop.permute.xlu0 %771  ;;  %v1043_v56 = vsel %vm1042_vm15, %v962_v9, %v883_v2 }
 0x201   :  { %v1040_v5 = vrot.slane %v772_v6, %v880_v29 }
 0x203   :  { %v1041_v55 = vsel %vm882_vm14, %v1040_v5, %v1036_v23 }
 0x204   :  { %v1045_v4 = vsel %vm1044_vm0, %v1041_v55, %v1043_v56 }
 0x205   :  { %1047 = vst [vmem:[%s1479_s3] sm:$0x7] %v1045_v4 }
 0x206   :  { %1052 = vsyncpa [#allocation3], 1 }
 0x207   :  { %1053 = vsyncpa [#allocation5], 1 }

</bundles_post_ra>
